<compile_context>
chip_gen: v7x
topology: tpu7x:2x2x1
jax: 0.10.0
libtpu: 0.0.40
codegen_flags: <defaults>
</compile_context>

<pallas_src>
import functools

import jax
import jax.numpy as jnp
from jax.experimental import pallas as pl
from jax.experimental.pallas import tpu as pltpu

_LANES = 128


def _num_tensorcores():
    """Best-effort TensorCores-per-chip count (perf heuristic only; both
    settings are correct on every chip)."""
    try:
        kind = jax.devices()[0].device_kind.lower()
    except Exception:
        return 1
    # v7x (and v4 / v5p megacore) have 2 TensorCores per chip; v5e/v6e have 1.
    return 2 if ("v7" in kind or "v4" in kind or "v5p" in kind) else 1


def _dsc_partial_kernel(o_ref, t_ref, inter_ref, sum_ref, *,
                        tiles_per_shard, r_tile, n_rows, has_tail):
    c = pl.program_id(0)   # shard (parallel across TensorCores on v7x)
    k = pl.program_id(1)   # reduction step within the shard

    @pl.when(k == 0)
    def _():
        inter_ref[...] = jnp.zeros_like(inter_ref)
        sum_ref[...] = jnp.zeros_like(sum_ref)

    def accumulate(o, t):
        # Per-lane partial sums only (no cross-lane reduction in the hot loop).
        inter_ref[...] += jnp.sum(o * t, axis=1)[None]
        sum_ref[...] += jnp.sum(o + t, axis=1)[None]

    if not has_tail:
        # Fast path: every tile is full -> minimal per-element op count.
        accumulate(o_ref[...].astype(jnp.float32),
                   t_ref[...].astype(jnp.float32))
    else:
        tile_start = (c * tiles_per_shard + k) * r_tile
        is_full = tile_start + r_tile <= n_rows
        is_partial = jnp.logical_and(tile_start < n_rows,
                                     jnp.logical_not(is_full))
        # Fully out-of-range (clamped duplicate) tiles skip compute entirely.

        @pl.when(is_full)
        def _():
            accumulate(o_ref[...].astype(jnp.float32),
                       t_ref[...].astype(jnp.float32))

        @pl.when(is_partial)
        def _():
            o = o_ref[...].astype(jnp.float32)
            t = t_ref[...].astype(jnp.float32)
            # Small (1, r_tile, 1) row-index iota; the select broadcasts it
            # over B and the 128 lanes.
            rows = tile_start + jax.lax.broadcasted_iota(
                jnp.int32, (1, r_tile, 1), 1)
            valid = rows < n_rows
            accumulate(jnp.where(valid, o, 0.0), jnp.where(valid, t, 0.0))


def dsc_loss(output, target, *, max_block_bytes=4 << 20, num_shards=None):
    """Dice loss, matching the PyTorch DSC module's forward semantics.

    output, target: any shape with leading batch dim (e.g. NCHW). Returns (B,).
    """
    B = target.shape[0]
    o = output.reshape(B, -1)
    t = target.reshape(B, -1)
    N = o.shape[1]

    # Lane-major layout.  128-aligned N is the fast path (pure bitcast
    # reshape); ragged N pays one extra HBM pass for the zero pad (zeros are
    # neutral for all sums).
    # TODO(synk): for ragged-N-heavy workloads, replace the pad with
    # memory_space=pl.ANY + manual strided DMA and an in-kernel lane mask.
    Np = ((N + _LANES - 1) // _LANES) * _LANES
    if Np != N:
        o = jnp.pad(o, ((0, 0), (0, Np - N)))
        t = jnp.pad(t, ((0, 0), (0, Np - N)))
    R = Np // _LANES
    o = o.reshape(B, R, _LANES)
    t = t.reshape(B, R, _LANES)

    itemsize = max(jnp.dtype(o.dtype).itemsize, jnp.dtype(t.dtype).itemsize)

    # Reduction tile: as many rows as fit the per-input byte budget, multiple
    # of 8 sublanes, no larger than the array itself.  (Note: the 8-row floor
    # means very large B may need a bigger VMEM limit; handled below since the
    # limit is derived from the actual block size.)
    r_tile = max_block_bytes // (B * _LANES * itemsize)
    r_tile = max(8, r_tile)
    r_tile -= r_tile % 8
    if r_tile >= R:
        r_tile = R
    n_tiles = pl.cdiv(R, r_tile)

    if num_shards is None:
        num_shards = _num_tensorcores()
    shards = num_shards if n_tiles >= num_shards else 1
    tiles_per_shard = pl.cdiv(n_tiles, shards)
    # True if any logical tile is partial or fully out of range.
    has_tail = shards * tiles_per_shard * r_tile != R

    def in_map(c, k):
        # Clamp to a valid block; the kernel masks the partial tail tile and
        # skips compute on fully out-of-range (clamped duplicate) tiles.
        return (0, jnp.minimum(c * tiles_per_shard + k, n_tiles - 1), 0)

    def out_map(c, k):
        return (c, 0, 0)

    kernel = functools.partial(
        _dsc_partial_kernel,
        tiles_per_shard=tiles_per_shard,
        r_tile=r_tile,
        n_rows=R,
        has_tail=has_tail,
    )

    # Pipeline footprint: 2 inputs x 2 buffers x block (+ tiny outputs).
    block_bytes = B * r_tile * _LANES * itemsize
    out_bytes = B * _LANES * 4
    vmem_limit = max(32 << 20, 4 * block_bytes + 4 * out_bytes + (2 << 20))

    part = jax.ShapeDtypeStruct((shards, B, _LANES), jnp.float32)
    inter_p, sum_p = pl.pallas_call(
        kernel,
        out_shape=(part, part),
        grid_spec=pltpu.PrefetchScalarGridSpec(
            num_scalar_prefetch=0,
            grid=(shards, tiles_per_shard),
            in_specs=[
                pl.BlockSpec((B, r_tile, _LANES), in_map),
                pl.BlockSpec((B, r_tile, _LANES), in_map),
            ],
            out_specs=[
                pl.BlockSpec((1, B, _LANES), out_map),
                pl.BlockSpec((1, B, _LANES), out_map),
            ],
        ),
        compiler_params=pltpu.CompilerParams(
            dimension_semantics=("parallel", "arbitrary"),
            vmem_limit_bytes=int(vmem_limit),
        ),
        cost_estimate=pl.CostEstimate(
            flops=3 * B * Np,
            transcendentals=0,
            bytes_accessed=2 * B * Np * itemsize,
        ),
    )(o, t)

    # Tiny cross-lane / cross-shard reduction + Dice arithmetic in the wrapper.
    inter = jnp.sum(inter_p, axis=(0, 2))
    union = jnp.sum(sum_p, axis=(0, 2)) + 1e-10
    return 1.0 - (2.0 * inter + 1e-10) / union


def dsc_loss_ref(output, target):
    B = target.shape[0]
    o = output.reshape(B, -1).astype(jnp.float32)
    t = target.reshape(B, -1).astype(jnp.float32)
    inter = jnp.sum(o * t, axis=1)
    union = jnp.sum(o, axis=1) + jnp.sum(t, axis=1) + 1e-10
    return 1.0 - (2.0 * inter + 1e-10) / union


if __name__ == "__main__":
    key = jax.random.PRNGKey(0)
    k1, k2, k3, k4 = jax.random.split(key, 4)

    # Test 1: canonical NCHW shape (batch=2, channels=4, 16x16) — exercises
    # the single-tile fast path (no masking, no tail branches).
    out1 = jax.nn.sigmoid(jax.random.normal(k1, (2, 4, 16, 16), jnp.float32))
    tgt1 = (jax.random.uniform(k2, (2, 4, 16, 16)) > 0.5).astype(jnp.float32)
    loss1 = dsc_loss(out1, tgt1)
    jax.block_until_ready(loss1)
    ref1 = dsc_loss_ref(out1, tgt1)
    assert loss1.shape == (2,)
    assert jnp.allclose(loss1, ref1, rtol=1e-5, atol=1e-6), (loss1, ref1)

    # Test 2: ragged shape + tiny block budget + forced 2-shard split —
    # exercises lane padding, the full-tile / partial-tile / skipped-tile
    # branches, and the cross-shard reduction path.
    out2 = jax.nn.sigmoid(jax.random.normal(k3, (2, 3, 37, 40), jnp.float32))
    tgt2 = (jax.random.uniform(k4, (2, 3, 37, 40)) > 0.5).astype(jnp.float32)
    loss2 = dsc_loss(out2, tgt2, max_block_bytes=8 * 2 * _LANES * 4,
                     num_shards=2)
    jax.block_until_ready(loss2)
    ref2 = dsc_loss_ref(out2, tgt2)
    assert jnp.allclose(loss2, ref2, rtol=1e-5, atol=1e-6), (loss2, ref2)

    print("KERNEL_OK")
</pallas_src>

<mosaic_0001>
module attributes {stable_mosaic.version = 11 : i64} {
  func.func @_dsc_partial_kernel(%arg0: i32, %arg1: i32, %arg2: memref<2x8x128xf32, #tpu.memory_space<vmem>>, %arg3: memref<2x8x128xf32, #tpu.memory_space<vmem>>, %arg4: memref<1x2x128xf32, #tpu.memory_space<vmem>>, %arg5: memref<1x2x128xf32, #tpu.memory_space<vmem>>) attributes {dimension_semantics = [#tpu.dimension_semantics<parallel>, #tpu.dimension_semantics<arbitrary>], iteration_bounds = array<i64: 1, 1>, scalar_prefetch = 0 : i64, scratch_operands = 0 : i64, tpu.core_type = #tpu.core_type<tc>, window_params = [{transform_indices = @transform_0, window_bounds = array<i64: 2, 8, 128>}, {transform_indices = @transform_1, window_bounds = array<i64: 2, 8, 128>}, {transform_indices = @transform_2, window_bounds = array<i64: 1, 2, 128>}, {transform_indices = @transform_3, window_bounds = array<i64: 1, 2, 128>}]} {
    %c0_i32 = arith.constant 0 : i32
    %0 = arith.cmpi eq, %arg1, %c0_i32 : i32
    %1 = arith.extui %0 : i1 to i32
    %c0_i32_0 = arith.constant 0 : i32
    %2 = arith.cmpi ne, %1, %c0_i32_0 : i32
    scf.if %2 {
      %cst_19 = arith.constant 0.000000e+00 : f32
      %17 = vector.broadcast %cst_19 : f32 to vector<1x2x128xf32>
      %c0_20 = arith.constant 0 : index
      %c0_21 = arith.constant 0 : index
      %c0_22 = arith.constant 0 : index
      %18 = vector.load %arg4[%c0_20, %c0_21, %c0_22] : memref<1x2x128xf32, #tpu.memory_space<vmem>>, vector<1x2x128xf32>
      tpu.vector_store %arg4[%c0_20, %c0_21, %c0_22], %17 {strides = array<i32>} : memref<1x2x128xf32, #tpu.memory_space<vmem>>, vector<1x2x128xf32>,
      %cst_23 = arith.constant 0.000000e+00 : f32
      %19 = vector.broadcast %cst_23 : f32 to vector<1x2x128xf32>
      %c0_24 = arith.constant 0 : index
      %c0_25 = arith.constant 0 : index
      %c0_26 = arith.constant 0 : index
      %20 = vector.load %arg5[%c0_24, %c0_25, %c0_26] : memref<1x2x128xf32, #tpu.memory_space<vmem>>, vector<1x2x128xf32>
      tpu.vector_store %arg5[%c0_24, %c0_25, %c0_26], %19 {strides = array<i32>} : memref<1x2x128xf32, #tpu.memory_space<vmem>>, vector<1x2x128xf32>,
    } else {
    }
    %c0 = arith.constant 0 : index
    %c0_1 = arith.constant 0 : index
    %c0_2 = arith.constant 0 : index
    %3 = vector.load %arg2[%c0, %c0_1, %c0_2] : memref<2x8x128xf32, #tpu.memory_space<vmem>>, vector<2x8x128xf32>
    %c0_3 = arith.constant 0 : index
    %c0_4 = arith.constant 0 : index
    %c0_5 = arith.constant 0 : index
    %4 = vector.load %arg3[%c0_3, %c0_4, %c0_5] : memref<2x8x128xf32, #tpu.memory_space<vmem>>, vector<2x8x128xf32>
    %c0_6 = arith.constant 0 : index
    %c0_7 = arith.constant 0 : index
    %c0_8 = arith.constant 0 : index
    %5 = vector.load %arg4[%c0_6, %c0_7, %c0_8] : memref<1x2x128xf32, #tpu.memory_space<vmem>>, vector<1x2x128xf32>
    %6 = arith.mulf %3, %4 : vector<2x8x128xf32>
    %cst = arith.constant dense<0.000000e+00> : vector<2x128xf32>
    %7 = vector.multi_reduction <add>, %6, %cst [1] : vector<2x8x128xf32> to vector<2x128xf32>
    %8 = vector.shape_cast %7 : vector<2x128xf32> to vector<1x2x128xf32>
    %9 = arith.addf %5, %8 : vector<1x2x128xf32>
    %c0_9 = arith.constant 0 : index
    %c0_10 = arith.constant 0 : index
    %c0_11 = arith.constant 0 : index
    %10 = vector.load %arg4[%c0_9, %c0_10, %c0_11] : memref<1x2x128xf32, #tpu.memory_space<vmem>>, vector<1x2x128xf32>
    tpu.vector_store %arg4[%c0_9, %c0_10, %c0_11], %9 {strides = array<i32>} : memref<1x2x128xf32, #tpu.memory_space<vmem>>, vector<1x2x128xf32>,
    %c0_12 = arith.constant 0 : index
    %c0_13 = arith.constant 0 : index
    %c0_14 = arith.constant 0 : index
    %11 = vector.load %arg5[%c0_12, %c0_13, %c0_14] : memref<1x2x128xf32, #tpu.memory_space<vmem>>, vector<1x2x128xf32>
    %12 = arith.addf %3, %4 : vector<2x8x128xf32>
    %cst_15 = arith.constant dense<0.000000e+00> : vector<2x128xf32>
    %13 = vector.multi_reduction <add>, %12, %cst_15 [1] : vector<2x8x128xf32> to vector<2x128xf32>
    %14 = vector.shape_cast %13 : vector<2x128xf32> to vector<1x2x128xf32>
    %15 = arith.addf %11, %14 : vector<1x2x128xf32>
    %c0_16 = arith.constant 0 : index
    %c0_17 = arith.constant 0 : index
    %c0_18 = arith.constant 0 : index
    %16 = vector.load %arg5[%c0_16, %c0_17, %c0_18] : memref<1x2x128xf32, #tpu.memory_space<vmem>>, vector<1x2x128xf32>
    tpu.vector_store %arg5[%c0_16, %c0_17, %c0_18], %15 {strides = array<i32>} : memref<1x2x128xf32, #tpu.memory_space<vmem>>, vector<1x2x128xf32>,
    return
  }
  func.func @transform_0(%arg0: i32, %arg1: i32) -> (i32, i32, i32) {
    %c1_i32 = arith.constant 1 : i32
    %0 = arith.muli %arg0, %c1_i32 : i32
    %1 = arith.addi %0, %arg1 : i32
    %c0_i32 = arith.constant 0 : i32
    %2 = arith.minsi %1, %c0_i32 : i32
    %c0_i32_0 = arith.constant 0 : i32
    %c0_i32_1 = arith.constant 0 : i32
    %c0_i32_2 = arith.constant 0 : i32
    return %c0_i32_0, %2, %c0_i32_1 : i32, i32, i32
  }
  func.func @transform_1(%arg0: i32, %arg1: i32) -> (i32, i32, i32) {
    %c1_i32 = arith.constant 1 : i32
    %0 = arith.muli %arg0, %c1_i32 : i32
    %1 = arith.addi %0, %arg1 : i32
    %c0_i32 = arith.constant 0 : i32
    %2 = arith.minsi %1, %c0_i32 : i32
    %c0_i32_0 = arith.constant 0 : i32
    %c0_i32_1 = arith.constant 0 : i32
    %c0_i32_2 = arith.constant 0 : i32
    return %c0_i32_0, %2, %c0_i32_1 : i32, i32, i32
  }
  func.func @transform_2(%arg0: i32, %arg1: i32) -> (i32, i32, i32) {
    %c0_i32 = arith.constant 0 : i32
    %c0_i32_0 = arith.constant 0 : i32
    %c0_i32_1 = arith.constant 0 : i32
    return %arg0, %c0_i32, %c0_i32_0 : i32, i32, i32
  }
  func.func @transform_3(%arg0: i32, %arg1: i32) -> (i32, i32, i32) {
    %c0_i32 = arith.constant 0 : i32
    %c0_i32_0 = arith.constant 0 : i32
    %c0_i32_1 = arith.constant 0 : i32
    return %arg0, %c0_i32, %c0_i32_0 : i32, i32, i32
  }
}

</mosaic_0001>

<bundles_post_ra>
// kernel: tpu_custom_call.1
= control target key start
LH: loop header
LB: loop body
LE: loop exit
PB: predicated region body
PF: predicated region fallthrough
CT: control target
= control target key end

     0   :  { %9 = vsyncpa [#allocation3], 0  ;;  %s324_s0 = inlined_call_operand.hbm [shape: f32[2,8,128], index: 0, kind: input, shape index: {}]   ;;  %s325_s1 = inlined_call_operand.hbm [shape: f32[2,8,128], index: 1, kind: input, shape index: {}]   ;;  %s326_s2 = inlined_call_operand.hbm [shape: f32[1,2,128], index: 2, kind: output, shape index: {0}]   ;;  %s327_s3 = inlined_call_operand.hbm [shape: f32[1,2,128], index: 3, kind: output, shape index: {1}]  }
   0x1   :  { %10 = vsyncpa [#allocation6], 0 }
   0x2   :  { %11 = vsyncpa [#allocation4], 0 }
   0x3   :  { %12 = vsyncpa [#allocation9], 0  ;;  %s249_s12 = smov [#allocation2]   ;;  %s153_s16 = scalar_lea.hbm %s324_s0, 256 }
   0x4   :  { %s23_s13 = sshll.u32 %s249_s12, 4  ;;  %p154_p0 = scmp.ne.s32.totalorder %s324_s0, %s153_s16  ;;  %s24_s13 = int_to_ptr.vmem [resolvable:$true] %s23_s13 }
   0x5   :  { %p157_p1 = scmp.lt.u32.totalorder %s153_s16, %s324_s0 }
   0x7   :  { %p159_p2 = pnand %p157_p1, %p154_p0 }
   0x9   :  { %162 = shalt.err (!%p159_p2)
}
   0xa   :  { %s163_s21 = scalar_lea.vmem %s24_s13, 256  ;;  %p168_p4 = scmp.lt.s32.totalorder %s24_s13, %s24_s13 }
   0xb   :  { %p164_p3 = scmp.ne.s32.totalorder %s24_s13, %s163_s21  ;;  %p169_p5 = scmp.lt.s32.totalorder %s163_s21, %s163_s21 }
   0xd   :  { %p170_p6 = por %p169_p5, %p168_p4 }
   0xf   :  { %p171_p7 = pnand %p170_p6, %p164_p3 }
  0x11   :  { %174 = shalt.err (!%p171_p7)
}
  0x12   :  { %s250_s22 = smov 128   ;;  %s251_s23 = smov 8  }
  0x13   :  { %29 = dma.hbm_to_vmem [thread:$0]  %s324_s0, 256, %s24_s13, [#allocation3], %s250_s22, %s250_s22, %s251_s23  }
  0x14   :  { %s252_s26 = smov [#allocation5]   ;;  %s175_s30 = scalar_lea.hbm %s325_s1, 256 }
  0x15   :  { %s40_s27 = sshll.u32 %s252_s26, 4  ;;  %p176_p8 = scmp.ne.s32.totalorder %s325_s1, %s175_s30  ;;  %s41_s27 = int_to_ptr.vmem [resolvable:$true] %s40_s27 }
  0x16   :  { %p179_p9 = scmp.lt.u32.totalorder %s175_s30, %s325_s1 }
  0x18   :  { %p181_p10 = pnand %p179_p9, %p176_p8 }
  0x1a   :  { %184 = shalt.err (!%p181_p10)
}
  0x1b   :  { %s185_s8 = scalar_lea.vmem %s41_s27, 256  ;;  %p190_p12 = scmp.lt.s32.totalorder %s41_s27, %s41_s27 }
  0x1c   :  { %p186_p11 = scmp.ne.s32.totalorder %s41_s27, %s185_s8  ;;  %p191_p13 = scmp.lt.s32.totalorder %s185_s8, %s185_s8 }
  0x1e   :  { %p192_p0 = por %p191_p13, %p190_p12 }
  0x20   :  { %p193_p1 = pnand %p192_p0, %p186_p11 }
  0x22   :  { %196 = shalt.err (!%p193_p1)
}
  0x23   :  { %46 = dma.hbm_to_vmem [thread:$0]  %s325_s1, 256, %s41_s27, [#allocation6], %s250_s22, %s250_s22, %s251_s23  }
  0x24   :  { %241 = dma.done.wait [#allocation3], 256  }
  0x25   :  { %242 = vsyncadd [#allocation3], 4294967040 }
  0x26   :  { %243 = dma.done.wait [#allocation6], 256  }
  0x27   :  { %244 = vsyncadd [#allocation6], 4294967040  ;;  %v253_v0 = vmov 0.0   ;;  %v65_v1 = vld [vmem:[#allocation2] sm:$0xff]  ;;  %v66_v2 = vld [vmem:[#allocation2 + $0x8] sm:$0xff]  ;;  %vm86_vm0 = vcmask 1041409  }
  0x28   :  { %63 = vst [vmem:[#allocation7] sm:$0x3] %v253_v0  ;;  %64 = vst [vmem:[#allocation8] sm:$0x3] %v253_v0  ;;  %v67_v3 = vld [vmem:[#allocation5] sm:$0xff]  ;;  %v68_v4 = vld [vmem:[#allocation5 + $0x8] sm:$0xff] }
  0x29   :  { %v70_v5 = vmul.f32 %v67_v3, %v65_v1  ;;  %v92_v6 = vadd.f32 %v67_v3, %v65_v1  ;;  %v71_v7 = vmul.f32 %v68_v4, %v66_v2  ;;  %v93_v8 = vadd.f32 %v68_v4, %v66_v2  ;;  %s254_s1 = smov [#allocation7]   ;;  %s255_s11 = smov [#allocation8]  }
  0x2a   :  { %s118_s10 = sshll.u32 %s254_s1, 4  ;;  %s128_s12 = sshll.u32 %s255_s11, 4  ;;  %s119_s10 = int_to_ptr.vmem [resolvable:$true] %s118_s10  ;;  %s129_s12 = int_to_ptr.vmem [resolvable:$true] %s128_s12 }
  0x2b   :  { %v72_v9 = vrot.slane %v70_v5, 4  ;;  %v94_v10 = vrot.slane %v92_v6, 4  ;;  %v78_v11 = vrot.slane %v71_v7, 4  ;;  %v100_v12 = vrot.slane %v93_v8, 4  ;;  %s197_s13 = scalar_lea.vmem %s119_s10, 32  ;;  %p202_p3 = scmp.lt.s32.totalorder %s119_s10, %s119_s10 }
  0x2c   :  { %p198_p2 = scmp.ne.s32.totalorder %s119_s10, %s197_s13  ;;  %p203_p4 = scmp.lt.s32.totalorder %s197_s13, %s197_s13 }
  0x2d   :  { %v73_v13 = vadd.f32 %v72_v9, %v70_v5  ;;  %v95_v14 = vadd.f32 %v94_v10, %v92_v6  ;;  %v79_v15 = vadd.f32 %v78_v11, %v71_v7  ;;  %v101_v16 = vadd.f32 %v100_v12, %v93_v8 }
  0x2e   :  { %p204_p5 = por %p203_p4, %p202_p3 }
  0x2f   :  { %v74_v17 = vrot.slane %v73_v13, 2  ;;  %v96_v18 = vrot.slane %v95_v14, 2  ;;  %v80_v19 = vrot.slane %v79_v15, 2  ;;  %v102_v20 = vrot.slane %v101_v16, 2  ;;  %v69_v31 = vld [vmem:[#allocation7] sm:$0x3] }
  0x30   :  { %v91_v33 = vld [vmem:[#allocation8] sm:$0x3]  ;;  %p205_p6 = pnand %p204_p5, %p198_p2 }
  0x31   :  { %v75_v21 = vadd.f32 %v74_v17, %v73_v13  ;;  %v97_v22 = vadd.f32 %v96_v18, %v95_v14  ;;  %v81_v23 = vadd.f32 %v80_v19, %v79_v15  ;;  %v103_v24 = vadd.f32 %v102_v20, %v101_v16 }
  0x33   :  { %v76_v25 = vrot.slane %v75_v21, 1  ;;  %v98_v26 = vrot.slane %v97_v22, 1  ;;  %v82_v27 = vrot.slane %v81_v23, 1  ;;  %v104_v28 = vrot.slane %v103_v24, 1 }
  0x35   :  { %v77_v29 = vadd.f32 %v76_v25, %v75_v21  ;;  %v99_v30 = vadd.f32 %v98_v26, %v97_v22  ;;  %v83_v32 = vadd.f32 %v82_v27, %v81_v23  ;;  %v105_v34 = vadd.f32 %v104_v28, %v103_v24 }
  0x37   :  { %v87_v35 = vsel %vm86_vm0, %v83_v32, %v77_v29  ;;  %v108_v36 = vsel %vm86_vm0, %v105_v34, %v99_v30 }
  0x38   :  { %v89_v37 = vadd.f32 %v87_v35, %v69_v31  ;;  %v110_v38 = vadd.f32 %v108_v36, %v91_v33 }
  0x3a   :  { %90 = vst [vmem:[#allocation7] sm:$0x3] %v89_v37  ;;  %111 = vst [vmem:[#allocation8] sm:$0x3] %v110_v38 }
  0x3b   :  { %208 = shalt.err (!%p205_p6)
}
  0x3c   :  { %s209_s16 = scalar_lea.hbm %s326_s2, 32 }
  0x3d   :  { %p210_p7 = scmp.ne.s32.totalorder %s326_s2, %s209_s16  ;;  %p213_p8 = scmp.lt.u32.totalorder %s209_s16, %s326_s2 }
  0x3f   :  { %p215_p9 = pnand %p213_p8, %p210_p7 }
  0x41   :  { %218 = shalt.err (!%p215_p9)
}
  0x42   :  { %121 = dma.vmem_to_hbm [thread:$0]  %s119_s10, 32, %s326_s2, [#allocation4]  }
  0x43   :  { %s219_s23 = scalar_lea.vmem %s129_s12, 32  ;;  %p224_p11 = scmp.lt.s32.totalorder %s129_s12, %s129_s12 }
  0x44   :  { %p220_p10 = scmp.ne.s32.totalorder %s129_s12, %s219_s23  ;;  %p225_p12 = scmp.lt.s32.totalorder %s219_s23, %s219_s23 }
  0x46   :  { %p226_p13 = por %p225_p12, %p224_p11 }
  0x48   :  { %p227_p0 = pnand %p226_p13, %p220_p10 }
  0x4a   :  { %230 = shalt.err (!%p227_p0)
}
  0x4b   :  { %s231_s26 = scalar_lea.hbm %s327_s3, 32 }
  0x4c   :  { %p232_p1 = scmp.ne.s32.totalorder %s327_s3, %s231_s26  ;;  %p235_p2 = scmp.lt.u32.totalorder %s231_s26, %s327_s3 }
  0x4e   :  { %p237_p3 = pnand %p235_p2, %p232_p1 }
  0x50   :  { %240 = shalt.err (!%p237_p3)
}
  0x51   :  { %131 = dma.vmem_to_hbm [thread:$0]  %s129_s12, 32, %s327_s3, [#allocation9]  }
  0x52   :  { %245 = dma.done.wait [#allocation4], 32  }
  0x53   :  { %246 = vsyncadd [#allocation4], 4294967264 }
  0x54   :  { %247 = dma.done.wait [#allocation9], 32  }
  0x55   :  { %248 = vsyncadd [#allocation9], 4294967264 }
  0x56   :  { %138 = vsyncpa [#allocation3], 1 }
  0x57   :  { %139 = vsyncpa [#allocation6], 1 }
  0x58   :  { %140 = vsyncpa [#allocation4], 1 }
  0x59   :  { %141 = vsyncpa [#allocation9], 1 }

</bundles_post_ra>
